<compile_context>
chip_gen: v7x
topology: tpu7x:2x2x1
jax: 0.10.0
libtpu: 0.0.40
codegen_flags: <defaults>
</compile_context>

<pallas_src>
import math

import jax
import jax.numpy as jnp
from jax import lax
from jax.experimental import pallas as pl
from jax.experimental.pallas import tpu as pltpu


def _rnn_chunk_kernel(xproj_ref, h0_ref, w_hh_ref, w_out_ref, b_out_ref,
                      out_ref, state_ref, y_scratch):
    """One grid step processes `t_chunk` timesteps of the recurrence."""
    chunk = pl.program_id(0)
    t_chunk, batch, _ = xproj_ref.shape

    # Initialize the recurrent carry from the caller-provided initial state on
    # the first chunk. `state_ref` is a resident output block (constant
    # index_map) and doubles as the carry across grid steps.
    @pl.when(chunk == 0)
    def _():
        state_ref[0] = h0_ref[0]

    def step(i, h):
        # h_t = tanh(xproj_t + h_{t-1} @ W_hh); xproj already contains
        # x_t @ W_ih^T + b_ih + b_hh (computed as an embedding gather).
        h_new = jnp.tanh(
            xproj_ref[i]
            + jnp.dot(h.astype(w_hh_ref.dtype), w_hh_ref[...],
                      preferred_element_type=jnp.float32))
        row = pl.multiple_of(i * batch, batch)
        y_scratch[pl.ds(row, batch), :] = h_new
        return h_new

    h_last = lax.fori_loop(0, t_chunk, step, state_ref[0], unroll=True)
    state_ref[0] = h_last

    # Batched output projection over the whole chunk:
    # (t_chunk*batch, hidden) @ (hidden, vocab_padded) — one large-M MXU matmul
    # instead of a tiny M=batch matmul per timestep.
    out_ref[...] = (
        jnp.dot(y_scratch[...].astype(w_out_ref.dtype), w_out_ref[...],
                preferred_element_type=jnp.float32)
        + b_out_ref[...]
    ).astype(out_ref.dtype)


def rnn_model_forward(inputs, state, w_ih, w_hh, b_h, w_out, b_out, vocab_size,
                      *, t_chunk=None, mxu_dtype=jnp.bfloat16):
    """Pallas-backed RNNModel forward.

    inputs: (batch, seq) int32 token ids
    state : (1, batch, hidden) initial hidden state
    w_ih  : (vocab, hidden)   == PyTorch weight_ih_l0.T
    w_hh  : (hidden, hidden)  == PyTorch weight_hh_l0.T
    b_h   : (1, hidden)       == bias_ih_l0 + bias_hh_l0
    w_out : (hidden, vocab)   == PyTorch linear.weight.T
    b_out : (1, vocab)        == linear.bias
    Returns (output (seq*batch, vocab), state (1, batch, hidden)).
    """
    batch, seq = inputs.shape
    hidden = w_hh.shape[0]

    if t_chunk is None:
        t_chunk = min(seq, 32)
    assert seq % t_chunk == 0, "seq must be divisible by t_chunk"
    num_chunks = seq // t_chunk

    # X @ W_ih^T for one-hot X is exactly a row gather of w_ih. Precompute the
    # whole input projection (plus both biases) outside the sequential carry.
    ids = inputs.T                                        # (seq, batch)
    xproj = (jnp.take(w_ih, ids, axis=0) + b_h).astype(jnp.float32)

    # Pad vocab to a lane-dense multiple of 128 for unmasked output stores and
    # good MXU packing; columns are sliced back off after the call.
    v_pad = ((vocab_size + 127) // 128) * 128
    if v_pad != vocab_size:
        w_out = jnp.pad(w_out, ((0, 0), (0, v_pad - vocab_size)))
        b_out = jnp.pad(b_out, ((0, 0), (0, v_pad - vocab_size)))

    # bf16 MXU operands (f32 accumulation) halve resident-weight VMEM and use
    # the fast MXU path on v6e/v7x; elementwise math stays f32 (v5e-safe).
    w_hh_m = w_hh.astype(mxu_dtype)
    w_out_m = w_out.astype(mxu_dtype)
    b_out_f = b_out.astype(jnp.float32)
    state_f = state.astype(jnp.float32)

    # Explicit scoped-VMEM budget: resident weights + streamed blocks
    # (pessimistically assume double-buffering everywhere) + scratch + headroom.
    nbytes = lambda a: int(a.size) * a.dtype.itemsize
    resident = nbytes(w_hh_m) + nbytes(w_out_m) + nbytes(b_out_f)
    streamed = (t_chunk * batch * hidden * 4          # xproj block
                + t_chunk * batch * v_pad * 4         # output block
                + 2 * batch * hidden * 4)             # h0 + state blocks
    scratch_bytes = t_chunk * batch * hidden * 4
    vmem_limit = int(min(2 * (resident + streamed) + scratch_bytes + (16 << 20),
                         100 << 20))

    out2d, state_out = pl.pallas_call(
        _rnn_chunk_kernel,
        out_shape=(
            jax.ShapeDtypeStruct((seq * batch, v_pad), jnp.float32),
            jax.ShapeDtypeStruct((1, batch, hidden), jnp.float32),
        ),
        grid_spec=pltpu.PrefetchScalarGridSpec(
            num_scalar_prefetch=0,
            grid=(num_chunks,),
            in_specs=[
                # Per-chunk precomputed input projection.
                pl.BlockSpec((t_chunk, batch, hidden), lambda c: (c, 0, 0)),
                # Initial hidden state (resident, only read at chunk 0).
                pl.BlockSpec((1, batch, hidden), lambda c: (0, 0, 0)),
                # Resident weights / bias for the whole grid.
                pl.BlockSpec((hidden, hidden), lambda c: (0, 0)),
                pl.BlockSpec((hidden, v_pad), lambda c: (0, 0)),
                pl.BlockSpec((1, v_pad), lambda c: (0, 0)),
            ],
            out_specs=(
                # Lane-dense (t_chunk*batch, v_pad) output slab per chunk.
                pl.BlockSpec((t_chunk * batch, v_pad), lambda c: (c, 0)),
                # Final-state block: resident, doubles as the recurrent carry.
                pl.BlockSpec((1, batch, hidden), lambda c: (0, 0, 0)),
            ),
            scratch_shapes=[pltpu.VMEM((t_chunk * batch, hidden), jnp.float32)],
        ),
        compiler_params=pltpu.CompilerParams(
            # Time axis carries the recurrence -> sequential.
            dimension_semantics=("arbitrary",),
            vmem_limit_bytes=vmem_limit,
        ),
    )(xproj, state_f, w_hh_m, w_out_m, b_out_f)

    output = out2d[:, :vocab_size] if v_pad != vocab_size else out2d
    return output, state_out


def rnn_model_reference(inputs, state, w_ih, w_hh, b_h, w_out, b_out, vocab_size):
    """Pure-JAX reference (lax.scan) mirroring the PyTorch forward."""
    x = jax.nn.one_hot(inputs.T, vocab_size, dtype=jnp.float32)

    def step(h, x_t):
        h_new = jnp.tanh(x_t @ w_ih + h @ w_hh + b_h)
        return h_new, h_new

    h_last, ys = jax.lax.scan(step, state[0], x)
    output = ys.reshape(-1, ys.shape[-1]) @ w_out + b_out
    return output, h_last[None]


if __name__ == "__main__":
    key = jax.random.PRNGKey(0)
    k_in, k_h0, k_wih, k_whh, k_bh, k_wout, k_bout = jax.random.split(key, 7)

    # Small, MXU/lane-aligned shapes: batch=8, seq=16 (2 chunks of 8),
    # vocab=128, hidden=128.
    batch, seq, vocab, hidden = 8, 16, 128, 128
    t_chunk = 8
    scale = 1.0 / math.sqrt(hidden)

    inputs = jax.random.randint(k_in, (batch, seq), 0, vocab, dtype=jnp.int32)
    state = 0.1 * jax.random.normal(k_h0, (1, batch, hidden), dtype=jnp.float32)
    w_ih = jax.random.uniform(k_wih, (vocab, hidden), jnp.float32, -scale, scale)
    w_hh = jax.random.uniform(k_whh, (hidden, hidden), jnp.float32, -scale, scale)
    b_h = jax.random.uniform(k_bh, (1, hidden), jnp.float32, -scale, scale)
    w_out = jax.random.uniform(k_wout, (hidden, vocab), jnp.float32, -scale, scale)
    b_out = jax.random.uniform(k_bout, (1, vocab), jnp.float32, -scale, scale)

    ref_out, ref_state = rnn_model_reference(
        inputs, state, w_ih, w_hh, b_h, w_out, b_out, vocab)

    # f32 MXU operands: tight check against the f32 reference.
    out32, st32 = rnn_model_forward(
        inputs, state, w_ih, w_hh, b_h, w_out, b_out, vocab,
        t_chunk=t_chunk, mxu_dtype=jnp.float32)
    jax.block_until_ready((out32, st32))
    assert out32.shape == (seq * batch, vocab)
    assert st32.shape == (1, batch, hidden)
    assert bool(jnp.allclose(out32, ref_out, rtol=2e-3, atol=2e-3))
    assert bool(jnp.allclose(st32, ref_state, rtol=2e-3, atol=2e-3))

    # bf16 MXU operands (fast path on v6e/v7x): looser tolerance.
    out16, st16 = rnn_model_forward(
        inputs, state, w_ih, w_hh, b_h, w_out, b_out, vocab,
        t_chunk=t_chunk, mxu_dtype=jnp.bfloat16)
    jax.block_until_ready((out16, st16))
    assert out16.shape == (seq * batch, vocab)
    assert st16.shape == (1, batch, hidden)
    assert bool(jnp.allclose(out16, ref_out, rtol=2e-2, atol=2e-2))
    assert bool(jnp.allclose(st16, ref_state, rtol=2e-2, atol=2e-2))

    print("KERNEL_OK")
</pallas_src>

<mosaic_0001>
module attributes {stable_mosaic.version = 11 : i64} {
  func.func @_rnn_chunk_kernel(%arg0: i32, %arg1: memref<8x8x128xf32, #tpu.memory_space<vmem>>, %arg2: memref<1x8x128xf32, #tpu.memory_space<vmem>>, %arg3: memref<128x128xf32, #tpu.memory_space<vmem>>, %arg4: memref<128x128xf32, #tpu.memory_space<vmem>>, %arg5: memref<1x128xf32, #tpu.memory_space<vmem>>, %arg6: memref<64x128xf32, #tpu.memory_space<vmem>>, %arg7: memref<1x8x128xf32, #tpu.memory_space<vmem>>, %arg8: memref<64x128xf32, #tpu.memory_space<vmem>>) attributes {dimension_semantics = [#tpu.dimension_semantics<arbitrary>], iteration_bounds = array<i64: 2>, scalar_prefetch = 0 : i64, scratch_operands = 1 : i64, tpu.core_type = #tpu.core_type<tc>, window_params = [{transform_indices = @transform_0, window_bounds = array<i64: 8, 8, 128>}, {pipeline_mode = #tpu.pipeline_mode<synchronous>, transform_indices = @transform_1, window_bounds = array<i64: 1, 8, 128>}, {pipeline_mode = #tpu.pipeline_mode<synchronous>, transform_indices = @transform_2, window_bounds = array<i64: 128, 128>}, {pipeline_mode = #tpu.pipeline_mode<synchronous>, transform_indices = @transform_3, window_bounds = array<i64: 128, 128>}, {pipeline_mode = #tpu.pipeline_mode<synchronous>, transform_indices = @transform_4, window_bounds = array<i64: 1, 128>}, {transform_indices = @transform_5, window_bounds = array<i64: 64, 128>}, {pipeline_mode = #tpu.pipeline_mode<synchronous>, transform_indices = @transform_6, window_bounds = array<i64: 1, 8, 128>}]} {
    %c0_i32 = arith.constant 0 : i32
    %0 = arith.cmpi eq, %arg0, %c0_i32 : i32
    %1 = arith.extui %0 : i1 to i32
    %c0_i32_0 = arith.constant 0 : i32
    %2 = arith.cmpi ne, %1, %c0_i32_0 : i32
    scf.if %2 {
      %c0_71 = arith.constant 0 : index
      %c0_72 = arith.constant 0 : index
      %c0_73 = arith.constant 0 : index
      %103 = vector.load %arg2[%c0_71, %c0_72, %c0_73] : memref<1x8x128xf32, #tpu.memory_space<vmem>>, vector<1x8x128xf32>
      %104 = vector.shape_cast %103 : vector<1x8x128xf32> to vector<8x128xf32>
      %c0_74 = arith.constant 0 : index
      %c0_75 = arith.constant 0 : index
      %c0_76 = arith.constant 0 : index
      %105 = vector.load %arg7[%c0_74, %c0_75, %c0_76] : memref<1x8x128xf32, #tpu.memory_space<vmem>>, vector<1x8x128xf32>
      %106 = vector.shape_cast %105 : vector<1x8x128xf32> to vector<8x128xf32>
      %107 = vector.shape_cast %104 : vector<8x128xf32> to vector<1x8x128xf32>
      tpu.vector_store %arg7[%c0_74, %c0_75, %c0_76], %107 {strides = array<i32>} : memref<1x8x128xf32, #tpu.memory_space<vmem>>, vector<1x8x128xf32>,
    } else {
    }
    %c0 = arith.constant 0 : index
    %c0_1 = arith.constant 0 : index
    %c0_2 = arith.constant 0 : index
    %3 = vector.load %arg7[%c0, %c0_1, %c0_2] : memref<1x8x128xf32, #tpu.memory_space<vmem>>, vector<1x8x128xf32>
    %4 = vector.shape_cast %3 : vector<1x8x128xf32> to vector<8x128xf32>
    %c0_i32_3 = arith.constant 0 : i32
    %5 = arith.index_cast %c0_i32_3 : i32 to index
    %c0_4 = arith.constant 0 : index
    %c0_5 = arith.constant 0 : index
    %6 = vector.load %arg1[%5, %c0_4, %c0_5] : memref<8x8x128xf32, #tpu.memory_space<vmem>>, vector<1x8x128xf32>
    %7 = vector.shape_cast %6 : vector<1x8x128xf32> to vector<8x128xf32>
    %c0_6 = arith.constant 0 : index
    %c0_7 = arith.constant 0 : index
    %8 = vector.load %arg3[%c0_6, %c0_7] : memref<128x128xf32, #tpu.memory_space<vmem>>, vector<128x128xf32>
    %cst = arith.constant dense<0.000000e+00> : vector<8x128xf32>
    %9 = tpu.matmul %4, %8, %cst {dimension_numbers = #tpu.dot_dimension_numbers<[1], [0], [0], [1], [0, 0, 1, 1], [], []>} : vector<8x128xf32>, vector<128x128xf32>, vector<8x128xf32> -> vector<8x128xf32>
    %10 = arith.addf %7, %9 : vector<8x128xf32>
    %11 = math.tanh %10 : vector<8x128xf32>
    %c8_i32 = arith.constant 8 : i32
    %12 = arith.muli %c0_i32_3, %c8_i32 : i32
    %13 = tpu.assume_multiple %12, 8 : i32
    %14 = arith.index_cast %13 : i32 to index
    %c0_8 = arith.constant 0 : index
    %15 = vector.load %arg8[%14, %c0_8] : memref<64x128xf32, #tpu.memory_space<vmem>>, vector<8x128xf32>
    tpu.vector_store %arg8[%14, %c0_8], %11 {strides = array<i32>} : memref<64x128xf32, #tpu.memory_space<vmem>>, vector<8x128xf32>,
    %c1_i32 = arith.constant 1 : i32
    %16 = arith.index_cast %c1_i32 : i32 to index
    %c0_9 = arith.constant 0 : index
    %c0_10 = arith.constant 0 : index
    %17 = vector.load %arg1[%16, %c0_9, %c0_10] : memref<8x8x128xf32, #tpu.memory_space<vmem>>, vector<1x8x128xf32>
    %18 = vector.shape_cast %17 : vector<1x8x128xf32> to vector<8x128xf32>
    %c0_11 = arith.constant 0 : index
    %c0_12 = arith.constant 0 : index
    %19 = vector.load %arg3[%c0_11, %c0_12] : memref<128x128xf32, #tpu.memory_space<vmem>>, vector<128x128xf32>
    %cst_13 = arith.constant dense<0.000000e+00> : vector<8x128xf32>
    %20 = tpu.matmul %11, %19, %cst_13 {dimension_numbers = #tpu.dot_dimension_numbers<[1], [0], [0], [1], [0, 0, 1, 1], [], []>} : vector<8x128xf32>, vector<128x128xf32>, vector<8x128xf32> -> vector<8x128xf32>
    %21 = arith.addf %18, %20 : vector<8x128xf32>
    %22 = math.tanh %21 : vector<8x128xf32>
    %c8_i32_14 = arith.constant 8 : i32
    %23 = arith.muli %c1_i32, %c8_i32_14 : i32
    %24 = tpu.assume_multiple %23, 8 : i32
    %25 = arith.index_cast %24 : i32 to index
    %c0_15 = arith.constant 0 : index
    %26 = vector.load %arg8[%25, %c0_15] : memref<64x128xf32, #tpu.memory_space<vmem>>, vector<8x128xf32>
    tpu.vector_store %arg8[%25, %c0_15], %22 {strides = array<i32>} : memref<64x128xf32, #tpu.memory_space<vmem>>, vector<8x128xf32>,
    %c2_i32 = arith.constant 2 : i32
    %27 = arith.index_cast %c2_i32 : i32 to index
    %c0_16 = arith.constant 0 : index
    %c0_17 = arith.constant 0 : index
    %28 = vector.load %arg1[%27, %c0_16, %c0_17] : memref<8x8x128xf32, #tpu.memory_space<vmem>>, vector<1x8x128xf32>
    %29 = vector.shape_cast %28 : vector<1x8x128xf32> to vector<8x128xf32>
    %c0_18 = arith.constant 0 : index
    %c0_19 = arith.constant 0 : index
    %30 = vector.load %arg3[%c0_18, %c0_19] : memref<128x128xf32, #tpu.memory_space<vmem>>, vector<128x128xf32>
    %cst_20 = arith.constant dense<0.000000e+00> : vector<8x128xf32>
    %31 = tpu.matmul %22, %30, %cst_20 {dimension_numbers = #tpu.dot_dimension_numbers<[1], [0], [0], [1], [0, 0, 1, 1], [], []>} : vector<8x128xf32>, vector<128x128xf32>, vector<8x128xf32> -> vector<8x128xf32>
    %32 = arith.addf %29, %31 : vector<8x128xf32>
    %33 = math.tanh %32 : vector<8x128xf32>
    %c8_i32_21 = arith.constant 8 : i32
    %34 = arith.muli %c2_i32, %c8_i32_21 : i32
    %35 = tpu.assume_multiple %34, 8 : i32
    %36 = arith.index_cast %35 : i32 to index
    %c0_22 = arith.constant 0 : index
    %37 = vector.load %arg8[%36, %c0_22] : memref<64x128xf32, #tpu.memory_space<vmem>>, vector<8x128xf32>
    tpu.vector_store %arg8[%36, %c0_22], %33 {strides = array<i32>} : memref<64x128xf32, #tpu.memory_space<vmem>>, vector<8x128xf32>,
    %c3_i32 = arith.constant 3 : i32
    %38 = arith.index_cast %c3_i32 : i32 to index
    %c0_23 = arith.constant 0 : index
    %c0_24 = arith.constant 0 : index
    %39 = vector.load %arg1[%38, %c0_23, %c0_24] : memref<8x8x128xf32, #tpu.memory_space<vmem>>, vector<1x8x128xf32>
    %40 = vector.shape_cast %39 : vector<1x8x128xf32> to vector<8x128xf32>
    %c0_25 = arith.constant 0 : index
    %c0_26 = arith.constant 0 : index
    %41 = vector.load %arg3[%c0_25, %c0_26] : memref<128x128xf32, #tpu.memory_space<vmem>>, vector<128x128xf32>
    %cst_27 = arith.constant dense<0.000000e+00> : vector<8x128xf32>
    %42 = tpu.matmul %33, %41, %cst_27 {dimension_numbers = #tpu.dot_dimension_numbers<[1], [0], [0], [1], [0, 0, 1, 1], [], []>} : vector<8x128xf32>, vector<128x128xf32>, vector<8x128xf32> -> vector<8x128xf32>
    %43 = arith.addf %40, %42 : vector<8x128xf32>
    %44 = math.tanh %43 : vector<8x128xf32>
    %c8_i32_28 = arith.constant 8 : i32
    %45 = arith.muli %c3_i32, %c8_i32_28 : i32
    %46 = tpu.assume_multiple %45, 8 : i32
    %47 = arith.index_cast %46 : i32 to index
    %c0_29 = arith.constant 0 : index
    %48 = vector.load %arg8[%47, %c0_29] : memref<64x128xf32, #tpu.memory_space<vmem>>, vector<8x128xf32>
    tpu.vector_store %arg8[%47, %c0_29], %44 {strides = array<i32>} : memref<64x128xf32, #tpu.memory_space<vmem>>, vector<8x128xf32>,
    %c4_i32 = arith.constant 4 : i32
    %49 = arith.index_cast %c4_i32 : i32 to index
    %c0_30 = arith.constant 0 : index
    %c0_31 = arith.constant 0 : index
    %50 = vector.load %arg1[%49, %c0_30, %c0_31] : memref<8x8x128xf32, #tpu.memory_space<vmem>>, vector<1x8x128xf32>
    %51 = vector.shape_cast %50 : vector<1x8x128xf32> to vector<8x128xf32>
    %c0_32 = arith.constant 0 : index
    %c0_33 = arith.constant 0 : index
    %52 = vector.load %arg3[%c0_32, %c0_33] : memref<128x128xf32, #tpu.memory_space<vmem>>, vector<128x128xf32>
    %cst_34 = arith.constant dense<0.000000e+00> : vector<8x128xf32>
    %53 = tpu.matmul %44, %52, %cst_34 {dimension_numbers = #tpu.dot_dimension_numbers<[1], [0], [0], [1], [0, 0, 1, 1], [], []>} : vector<8x128xf32>, vector<128x128xf32>, vector<8x128xf32> -> vector<8x128xf32>
    %54 = arith.addf %51, %53 : vector<8x128xf32>
    %55 = math.tanh %54 : vector<8x128xf32>
    %c8_i32_35 = arith.constant 8 : i32
    %56 = arith.muli %c4_i32, %c8_i32_35 : i32
    %57 = tpu.assume_multiple %56, 8 : i32
    %58 = arith.index_cast %57 : i32 to index
    %c0_36 = arith.constant 0 : index
    %59 = vector.load %arg8[%58, %c0_36] : memref<64x128xf32, #tpu.memory_space<vmem>>, vector<8x128xf32>
    tpu.vector_store %arg8[%58, %c0_36], %55 {strides = array<i32>} : memref<64x128xf32, #tpu.memory_space<vmem>>, vector<8x128xf32>,
    %c5_i32 = arith.constant 5 : i32
    %60 = arith.index_cast %c5_i32 : i32 to index
    %c0_37 = arith.constant 0 : index
    %c0_38 = arith.constant 0 : index
    %61 = vector.load %arg1[%60, %c0_37, %c0_38] : memref<8x8x128xf32, #tpu.memory_space<vmem>>, vector<1x8x128xf32>
    %62 = vector.shape_cast %61 : vector<1x8x128xf32> to vector<8x128xf32>
    %c0_39 = arith.constant 0 : index
    %c0_40 = arith.constant 0 : index
    %63 = vector.load %arg3[%c0_39, %c0_40] : memref<128x128xf32, #tpu.memory_space<vmem>>, vector<128x128xf32>
    %cst_41 = arith.constant dense<0.000000e+00> : vector<8x128xf32>
    %64 = tpu.matmul %55, %63, %cst_41 {dimension_numbers = #tpu.dot_dimension_numbers<[1], [0], [0], [1], [0, 0, 1, 1], [], []>} : vector<8x128xf32>, vector<128x128xf32>, vector<8x128xf32> -> vector<8x128xf32>
    %65 = arith.addf %62, %64 : vector<8x128xf32>
    %66 = math.tanh %65 : vector<8x128xf32>
    %c8_i32_42 = arith.constant 8 : i32
    %67 = arith.muli %c5_i32, %c8_i32_42 : i32
    %68 = tpu.assume_multiple %67, 8 : i32
    %69 = arith.index_cast %68 : i32 to index
    %c0_43 = arith.constant 0 : index
    %70 = vector.load %arg8[%69, %c0_43] : memref<64x128xf32, #tpu.memory_space<vmem>>, vector<8x128xf32>
    tpu.vector_store %arg8[%69, %c0_43], %66 {strides = array<i32>} : memref<64x128xf32, #tpu.memory_space<vmem>>, vector<8x128xf32>,
    %c6_i32 = arith.constant 6 : i32
    %71 = arith.index_cast %c6_i32 : i32 to index
    %c0_44 = arith.constant 0 : index
    %c0_45 = arith.constant 0 : index
    %72 = vector.load %arg1[%71, %c0_44, %c0_45] : memref<8x8x128xf32, #tpu.memory_space<vmem>>, vector<1x8x128xf32>
    %73 = vector.shape_cast %72 : vector<1x8x128xf32> to vector<8x128xf32>
    %c0_46 = arith.constant 0 : index
    %c0_47 = arith.constant 0 : index
    %74 = vector.load %arg3[%c0_46, %c0_47] : memref<128x128xf32, #tpu.memory_space<vmem>>, vector<128x128xf32>
    %cst_48 = arith.constant dense<0.000000e+00> : vector<8x128xf32>
    %75 = tpu.matmul %66, %74, %cst_48 {dimension_numbers = #tpu.dot_dimension_numbers<[1], [0], [0], [1], [0, 0, 1, 1], [], []>} : vector<8x128xf32>, vector<128x128xf32>, vector<8x128xf32> -> vector<8x128xf32>
    %76 = arith.addf %73, %75 : vector<8x128xf32>
    %77 = math.tanh %76 : vector<8x128xf32>
    %c8_i32_49 = arith.constant 8 : i32
    %78 = arith.muli %c6_i32, %c8_i32_49 : i32
    %79 = tpu.assume_multiple %78, 8 : i32
    %80 = arith.index_cast %79 : i32 to index
    %c0_50 = arith.constant 0 : index
    %81 = vector.load %arg8[%80, %c0_50] : memref<64x128xf32, #tpu.memory_space<vmem>>, vector<8x128xf32>
    tpu.vector_store %arg8[%80, %c0_50], %77 {strides = array<i32>} : memref<64x128xf32, #tpu.memory_space<vmem>>, vector<8x128xf32>,
    %c7_i32 = arith.constant 7 : i32
    %82 = arith.index_cast %c7_i32 : i32 to index
    %c0_51 = arith.constant 0 : index
    %c0_52 = arith.constant 0 : index
    %83 = vector.load %arg1[%82, %c0_51, %c0_52] : memref<8x8x128xf32, #tpu.memory_space<vmem>>, vector<1x8x128xf32>
    %84 = vector.shape_cast %83 : vector<1x8x128xf32> to vector<8x128xf32>
    %c0_53 = arith.constant 0 : index
    %c0_54 = arith.constant 0 : index
    %85 = vector.load %arg3[%c0_53, %c0_54] : memref<128x128xf32, #tpu.memory_space<vmem>>, vector<128x128xf32>
    %cst_55 = arith.constant dense<0.000000e+00> : vector<8x128xf32>
    %86 = tpu.matmul %77, %85, %cst_55 {dimension_numbers = #tpu.dot_dimension_numbers<[1], [0], [0], [1], [0, 0, 1, 1], [], []>} : vector<8x128xf32>, vector<128x128xf32>, vector<8x128xf32> -> vector<8x128xf32>
    %87 = arith.addf %84, %86 : vector<8x128xf32>
    %88 = math.tanh %87 : vector<8x128xf32>
    %c8_i32_56 = arith.constant 8 : i32
    %89 = arith.muli %c7_i32, %c8_i32_56 : i32
    %90 = tpu.assume_multiple %89, 8 : i32
    %91 = arith.index_cast %90 : i32 to index
    %c0_57 = arith.constant 0 : index
    %92 = vector.load %arg8[%91, %c0_57] : memref<64x128xf32, #tpu.memory_space<vmem>>, vector<8x128xf32>
    tpu.vector_store %arg8[%91, %c0_57], %88 {strides = array<i32>} : memref<64x128xf32, #tpu.memory_space<vmem>>, vector<8x128xf32>,
    %c8_i32_58 = arith.constant 8 : i32
    %c0_59 = arith.constant 0 : index
    %c0_60 = arith.constant 0 : index
    %c0_61 = arith.constant 0 : index
    %93 = vector.load %arg7[%c0_59, %c0_60, %c0_61] : memref<1x8x128xf32, #tpu.memory_space<vmem>>, vector<1x8x128xf32>
    %94 = vector.shape_cast %93 : vector<1x8x128xf32> to vector<8x128xf32>
    %95 = vector.shape_cast %88 : vector<8x128xf32> to vector<1x8x128xf32>
    tpu.vector_store %arg7[%c0_59, %c0_60, %c0_61], %95 {strides = array<i32>} : memref<1x8x128xf32, #tpu.memory_space<vmem>>, vector<1x8x128xf32>,
    %c0_62 = arith.constant 0 : index
    %c0_63 = arith.constant 0 : index
    %96 = vector.load %arg8[%c0_62, %c0_63] : memref<64x128xf32, #tpu.memory_space<vmem>>, vector<64x128xf32>
    %c0_64 = arith.constant 0 : index
    %c0_65 = arith.constant 0 : index
    %97 = vector.load %arg4[%c0_64, %c0_65] : memref<128x128xf32, #tpu.memory_space<vmem>>, vector<128x128xf32>
    %cst_66 = arith.constant dense<0.000000e+00> : vector<64x128xf32>
    %98 = tpu.matmul %96, %97, %cst_66 {dimension_numbers = #tpu.dot_dimension_numbers<[1], [0], [0], [1], [0, 0, 1, 1], [], []>} : vector<64x128xf32>, vector<128x128xf32>, vector<64x128xf32> -> vector<64x128xf32>
    %c0_67 = arith.constant 0 : index
    %c0_68 = arith.constant 0 : index
    %99 = vector.load %arg5[%c0_67, %c0_68] : memref<1x128xf32, #tpu.memory_space<vmem>>, vector<1x128xf32>
    %100 = vector.broadcast %99 : vector<1x128xf32> to vector<64x128xf32>
    %101 = arith.addf %98, %100 : vector<64x128xf32>
    %c0_69 = arith.constant 0 : index
    %c0_70 = arith.constant 0 : index
    %102 = vector.load %arg6[%c0_69, %c0_70] : memref<64x128xf32, #tpu.memory_space<vmem>>, vector<64x128xf32>
    tpu.vector_store %arg6[%c0_69, %c0_70], %101 {strides = array<i32>} : memref<64x128xf32, #tpu.memory_space<vmem>>, vector<64x128xf32>,
    return
  }
  func.func @transform_0(%arg0: i32) -> (i32, i32, i32) {
    %c0_i32 = arith.constant 0 : i32
    %c0_i32_0 = arith.constant 0 : i32
    %c0_i32_1 = arith.constant 0 : i32
    return %arg0, %c0_i32, %c0_i32_0 : i32, i32, i32
  }
  func.func @transform_1(%arg0: i32) -> (i32, i32, i32) {
    %c0_i32 = arith.constant 0 : i32
    %c0_i32_0 = arith.constant 0 : i32
    %c0_i32_1 = arith.constant 0 : i32
    %c0_i32_2 = arith.constant 0 : i32
    return %c0_i32, %c0_i32_0, %c0_i32_1 : i32, i32, i32
  }
  func.func @transform_2(%arg0: i32) -> (i32, i32) {
    %c0_i32 = arith.constant 0 : i32
    %c0_i32_0 = arith.constant 0 : i32
    %c0_i32_1 = arith.constant 0 : i32
    return %c0_i32, %c0_i32_0 : i32, i32
  }
  func.func @transform_3(%arg0: i32) -> (i32, i32) {
    %c0_i32 = arith.constant 0 : i32
    %c0_i32_0 = arith.constant 0 : i32
    %c0_i32_1 = arith.constant 0 : i32
    return %c0_i32, %c0_i32_0 : i32, i32
  }
  func.func @transform_4(%arg0: i32) -> (i32, i32) {
    %c0_i32 = arith.constant 0 : i32
    %c0_i32_0 = arith.constant 0 : i32
    %c0_i32_1 = arith.constant 0 : i32
    return %c0_i32, %c0_i32_0 : i32, i32
  }
  func.func @transform_5(%arg0: i32) -> (i32, i32) {
    %c0_i32 = arith.constant 0 : i32
    %c0_i32_0 = arith.constant 0 : i32
    return %arg0, %c0_i32 : i32, i32
  }
  func.func @transform_6(%arg0: i32) -> (i32, i32, i32) {
    %c0_i32 = arith.constant 0 : i32
    %c0_i32_0 = arith.constant 0 : i32
    %c0_i32_1 = arith.constant 0 : i32
    %c0_i32_2 = arith.constant 0 : i32
    return %c0_i32, %c0_i32_0, %c0_i32_1 : i32, i32, i32
  }
}

</mosaic_0001>

<bundles_post_ra>
// kernel: tpu_custom_call.1
= control target key start
LH: loop header
LB: loop body
LE: loop exit
PB: predicated region body
PF: predicated region fallthrough
CT: control target
= control target key end

     0   :  { %12 = vsyncpa [#allocation4], 0  ;;  %s2943_s0 = inlined_call_operand.hbm [shape: f32[16,8,128], index: 0, kind: input, shape index: {}]   ;;  %s2944_s1 = inlined_call_operand.hbm [shape: f32[1,8,128], index: 1, kind: input, shape index: {}]   ;;  %s2945_s2 = inlined_call_operand.hbm [shape: f32[128,128], index: 2, kind: input, shape index: {}]   ;;  %s2946_s3 = inlined_call_operand.hbm [shape: f32[128,128], index: 3, kind: input, shape index: {}]   ;;  %s2947_s4 = inlined_call_operand.vmem [shape: f32[1,128], index: 4, kind: input, shape index: {}]   ;;  %s2948_s5 = inlined_call_operand.hbm [shape: f32[128,128], index: 5, kind: output, shape index: {0}]   ;;  %s2949_s6 = inlined_call_operand.hbm [shape: f32[1,8,128], index: 6, kind: output, shape index: {1}]  }
   0x1   :  { %14 = vsyncpa [#allocation4 + $0x1], 0 }
   0x2   :  { %15 = vsyncpa [#allocation7], 0 }
   0x3   :  { %16 = vsyncpa [#allocation10], 0 }
   0x4   :  { %17 = vsyncpa [#allocation5], 0 }
   0x5   :  { %19 = vsyncpa [#allocation5 + $0x1], 0 }
   0x6   :  { %20 = vsyncpa [#allocation13], 0  ;;  %s2453_s21 = smov 0   ;;  %s2455_s22 = smov 0  }
   0x7   :  { %s2457_s23 = smov 0   ;;  %s2459_s24 = smov 0  }
   0x8 LB: > { %s2474_s25 = sadd.s32 4294967295, %s2403_s24   ;;  %s1337_s26 = sadd.s32 4294967294, %s2403_s24   ;;  %s2403_s24 = sphi %s2459_s24, %s2978_s24   ;;  %s2399_s23 = sphi %s2457_s23, %s2977_s23   ;;  %s2395_s22 = sphi %s2455_s22, %s2976_s22   ;;  %s2391_s21 = sphi %s2453_s21, %s2975_s21  }
   0x9   : > { %p46_p0 = scmp.ne.s32.totalorder %s2395_s22, %s2391_s21  ;;  %p2950_p1 = scmp.eq.s32.totalorder %s2474_s25, 0 }
   0xa   : > { %p160_p3 = scmp.eq.s32.totalorder %s1337_s26, 1  ;;  %p1338_p5 = scmp.ge.s32.totalorder %s2403_s24, 1 }
   0xb   : > { %p2483_p4 = por %p2950_p1, %p46_p0  ;;  %p188_p7 = scmp.lt.s32.totalorder %s2403_s24, 3 }
   0xc   : > { %p2488_p6 = por %p160_p3, %p46_p0  ;;  %s2405_s30 = smov [#allocation6]  }
   0xd   : > { %s2953_s27 = scalar_select %p2483_p4, 1, 0 }
   0xe   : > { %s2954_s28 = scalar_select %p2488_p6, 1, 0 }
   0xf   : > { %p2494_p9 = pnand %p1338_p5, %p188_p7  ;;  %s201_s7 = sshll.u32 %s2405_s30, 4  ;;  %s202_s7 = int_to_ptr.vmem [resolvable:$true] %s201_s7 }
  0x10   : > { %s2406_s8 = smov [#allocation8]   ;;  %s2407_s11 = smov [#allocation9]  }
  0x11   : > { %s2955_s29 = scalar_select %p2494_p9, 1, 0 }
  0x12   : > { %p2098_p11 = pneg %p2494_p9  ;;  %s211_s9 = sshll.u32 %s2406_s8, 4  ;;  %s2507_s9 = int_to_ptr.vmem [resolvable:$true] %s211_s9 }
  0x13   : > { %s2509_s12 = sshll.u32 %s2407_s11, 4  ;;  %s2185_s15 = scalar_lea.hbm %s2944_s1, 128  ;;  %s225_s12 = int_to_ptr.vmem [resolvable:$true] %s2509_s12 }
  0x14   : > { %p2503_p12 = pnand %p2098_p11, %p2950_p1  ;;  %p2186_p13 = scmp.ne.s32.totalorder %s2944_s1, %s2185_s15 }
  0x15   : > { %p2192_p7 = scmp.lt.u32.totalorder %s2185_s15, %s2944_s1 }
  0x16   : > { %p2519_p0 = pneg %p2503_p12 }
  0x18   : > { %p2188_p3 = pnand %p2519_p0, %p2186_p13 }
  0x1a   : > { %p2189_p5 = pneg %p2188_p3 }
  0x1c   : > { %p2194_p11 = pnand %p2192_p7, %p2189_p5 }
  0x1e   : > { %2197 = shalt.err (!%p2194_p11)
}
  0x1f   : > { %s2198_s26 = scalar_lea.vmem %s202_s7, 128  ;;  %p2206_p2 = scmp.lt.s32.totalorder %s202_s7, %s202_s7 }
  0x20   : > { %p2199_p10 = scmp.ne.s32.totalorder %s202_s7, %s2198_s26  ;;  %p2207_p6 = scmp.lt.s32.totalorder %s2198_s26, %s2198_s26 }
  0x22   : > { %p2201_p8 = pnand %p2199_p10, %p2519_p0  ;;  %p2208_p4 = por %p2207_p6, %p2206_p2 }
  0x24   : > { %p2202_p1 = pneg %p2201_p8 }
  0x26   : > { %p2209_p9 = pnand %p2208_p4, %p2202_p1 }
  0x28   : > { %2212 = shalt.err (!%p2209_p9)
}
  0x29   : > { %2101 = dma.hbm_to_vmem [thread:$0]  (!%p2503_p12), %s2944_s1, 128, %s202_s7, [#allocation7]  }
  0x2a   : > { %s2213_s14 = scalar_lea.hbm %s2945_s2, 2048 }
  0x2b   : > { %p2214_p8 = scmp.ne.s32.totalorder %s2945_s2, %s2213_s14  ;;  %p2220_p1 = scmp.lt.u32.totalorder %s2213_s14, %s2945_s2 }
  0x2d   : > { %p2216_p10 = pnand %p2214_p8, %p2519_p0 }
  0x2f   : > { %p2217_p2 = pneg %p2216_p10 }
  0x31   : > { %p2222_p4 = pnand %p2220_p1, %p2217_p2 }
  0x33   : > { %2225 = shalt.err (!%p2222_p4)
}
  0x34   : > { %s2226_s7 = scalar_lea.vmem %s2507_s9, 2048  ;;  %p2234_p3 = scmp.lt.s32.totalorder %s2507_s9, %s2507_s9 }
  0x35   : > { %p2227_p6 = scmp.ne.s32.totalorder %s2507_s9, %s2226_s7  ;;  %p2235_p5 = scmp.lt.s32.totalorder %s2226_s7, %s2226_s7 }
  0x37   : > { %p2229_p9 = pnand %p2227_p6, %p2519_p0  ;;  %p2236_p7 = por %p2235_p5, %p2234_p3 }
  0x39   : > { %p2230_p13 = pneg %p2229_p9 }
  0x3b   : > { %p2237_p11 = pnand %p2236_p7, %p2230_p13 }
  0x3d   : > { %2240 = shalt.err (!%p2237_p11)
}
  0x3e   : > { %s2408_s20 = smov 128   ;;  %s2409_s26 = smov 8  }
  0x3f   : > { %2104 = dma.hbm_to_vmem [thread:$0]  (!%p2503_p12), %s2945_s2, 2048, %s2507_s9, [#allocation7], %s2408_s20, %s2408_s20, %s2409_s26  }
  0x40   : > { %s2241_s14 = scalar_lea.hbm %s2946_s3, 2048 }
  0x41   : > { %p2242_p8 = scmp.ne.s32.totalorder %s2946_s3, %s2241_s14  ;;  %p2248_p1 = scmp.lt.u32.totalorder %s2241_s14, %s2946_s3 }
  0x43   : > { %p2244_p10 = pnand %p2242_p8, %p2519_p0 }
  0x45   : > { %p2245_p2 = pneg %p2244_p10 }
  0x47   : > { %p2250_p4 = pnand %p2248_p1, %p2245_p2 }
  0x49   : > { %2253 = shalt.err (!%p2250_p4)
}
  0x4a   : > { %s2254_s7 = scalar_lea.vmem %s225_s12, 2048  ;;  %p2262_p3 = scmp.lt.s32.totalorder %s225_s12, %s225_s12 }
  0x4b   : > { %p2255_p6 = scmp.ne.s32.totalorder %s225_s12, %s2254_s7  ;;  %p2263_p5 = scmp.lt.s32.totalorder %s2254_s7, %s2254_s7 }
  0x4d   : > { %p2257_p9 = pnand %p2255_p6, %p2519_p0  ;;  %p2264_p7 = por %p2263_p5, %p2262_p3 }
  0x4f   : > { %p2258_p13 = pneg %p2257_p9 }
  0x51   : > { %p2265_p11 = pnand %p2264_p7, %p2258_p13 }
  0x53   : > { %2268 = shalt.err (!%p2265_p11)
}
  0x54   : > { %2107 = dma.hbm_to_vmem [thread:$0]  (!%p2503_p12), %s2946_s3, 2048, %s225_s12, [#allocation10], %s2408_s20, %s2408_s20, %s2409_s26  }
  0x55   : > { %s2584_s18 = sadd.s32 1, %s2403_s24   ;;  %s33_s8 = sadd.s32 1, %s2399_s23 }
  0x56   : > { %s30_s10 = ssub.s32 %s2403_s24, %s2584_s18  ;;  %p40_p8 = scmp.ne.s32.totalorder %s2399_s23, %s2395_s22 }
  0x57   : > { %p31_p0 = scmp.eq.s32.totalorder %s30_s10, 0  ;;  %p41_p10 = scmp.eq.s32.totalorder %s2403_s24, 0 }
  0x58   : > { %p2119_p2 = scmp.lt.s32.totalorder %s2403_s24, 2  ;;  %p2958_p4 = scmp.eq.s32.totalorder %s2474_s25, 1 }
  0x59   : > { %s2594_s11 = scalar_select %p31_p0, %s2399_s23, %s33_s8  }
  0x5a   : > { %p42_p1 = por %p41_p10, %p40_p8  ;;  %p2598_p6 = por %p2958_p4, %p40_p8 }
  0x5b   : > { %s241_s14 = sand.u32 1, %s2399_s23   ;;  %s1368_s15 = sshll.u32 %s2403_s24, 10 }
  0x5c   : > { %s1343_s12 = sshll.u32 %s241_s14, 6  ;;  %s2607_s19 = scalar_lea.hbm %s2943_s0, %s1368_s15 }
  0x5d   : > { %s245_s7 = scalar_lea.vmem [#allocation3], %s1343_s12  ;;  %p2609_p12 = pnand %p2119_p2, %p42_p1 }
  0x5e   : > { %s252_s9 = sshll.u32 %s245_s7, 4  ;;  %s2615_s10 = scalar_lea.sflag [#allocation4], %s241_s14  ;;  %s2613_s9 = int_to_ptr.vmem [resolvable:$true] %s252_s9 }
  0x5f   : > { %s2269_s8 = scalar_lea.hbm %s2607_s19, 1024  ;;  %p2271_p13 = pneg %p2609_p12 }
  0x60   : > { %p2270_p9 = scmp.ne.s32.totalorder %s2607_s19, %s2269_s8  ;;  %s2274_s16 = scalar_lea.hbm %s2943_s0, 2048 }
  0x61   : > { %p2275_p7 = scmp.lt.u32.totalorder %s2607_s19, %s2943_s0  ;;  %p2276_p11 = scmp.lt.u32.totalorder %s2274_s16, %s2269_s8 }
  0x62   : > { %p2272_p3 = pnand %p2271_p13, %p2270_p9  ;;  %p2278_p8 = scmp.lt.u32.totalorder %s2269_s8, %s2607_s19 }
  0x63   : > { %p2277_p0 = por %p2276_p11, %p2275_p7 }
  0x64   : > { %p2273_p5 = pneg %p2272_p3 }
  0x65   : > { %p2279_p10 = por %p2278_p8, %p2277_p0 }
  0x67   : > { %p2280_p2 = pnand %p2279_p10, %p2273_p5 }
  0x69   : > { %2283 = shalt.err (!%p2280_p2)
}
  0x6a   : > { %s2284_s14 = scalar_lea.vmem %s2613_s9, 1024  ;;  %s2410_s15 = smov [#allocation3]  }
  0x6b   : > { %p2285_p1 = scmp.ne.s32.totalorder %s2613_s9, %s2284_s14  ;;  %s2289_s12 = sshll.u32 %s2410_s15, 4  ;;  %s2290_s12 = int_to_ptr.vmem [resolvable:$false] %s2289_s12 }
  0x6c   : > { %s2291_s17 = scalar_lea.vmem %s2290_s12, 2048  ;;  %p2292_p3 = scmp.lt.s32.totalorder %s2613_s9, %s2290_s12 }
  0x6d   : > { %p2287_p4 = pnand %p2285_p1, %p2271_p13  ;;  %p2293_p7 = scmp.lt.s32.totalorder %s2291_s17, %s2284_s14 }
  0x6f   : > { %p2288_p9 = pneg %p2287_p4  ;;  %p2294_p11 = por %p2293_p7, %p2292_p3 }
  0x71   : > { %p2295_p0 = pnand %p2294_p11, %p2288_p9 }
  0x73   : > { %2298 = shalt.err (!%p2295_p0)
}
  0x74   : > { %2111 = dma.hbm_to_vmem [thread:$0]  (!%p2609_p12), %s2607_s19, 1024, %s2613_s9, %s2615_s10, %s2408_s20, %s2408_s20, %s2409_s26  }
  0x75   : > { %p2961_p13 = scmp.ne.s32.totalorder %s2955_s29, 0 }
  0x76   : > { %s2649_s8 = sand.u32 (!%p2961_p13), 1, %s2395_s22   ;;  %p2962_p5 = scmp.ne.s32.totalorder (!%p2961_p13), %s2953_s27, 0 }
  0x77   : > { %264 = sbr.rel (%p2961_p13) target bundleno = 2212 (0x8a4), region = 40  ;;  %s1347_s16 = sshll.u32 (!%p2961_p13), %s2649_s8, 6 }
  0x78   : > { %s267_s7 = scalar_lea.sflag (!%p2961_p13), [#allocation4], %s2649_s8  ;;  %s2653_s14 = scalar_lea.vmem (!%p2961_p13), [#allocation3], %s1347_s16 }
  0x7e   : > { %2370 = dma.done.wait (%p2962_p5), %s267_s7, 1024  }
  0x7f   : > { %2372 = vsyncadd (%p2962_p5), %s267_s7, 4294966272  ;;  %p2963_p12 = scmp.eq.s32.totalorder %s2474_s25, 0 }
  0x81   : > { %2374 = dma.done.wait (%p2963_p12), [#allocation7], 2176   ;;  %p2964_p8 = pmov %p2963_p12 }
  0x83   : > { %2376 = vsyncadd (%p2964_p8), [#allocation7], 4294965120  ;;  %p2965_p10 = pmov %p2964_p8 }
  0x84   : > { %p2966_p2 = pmov %p2964_p8 }
  0x85   : > { %2378 = dma.done.wait (%p2965_p10), [#allocation10], 2048  }
  0x86   : > { %2380 = vsyncadd (%p2966_p2), [#allocation10], 4294965248  ;;  %s2667_s29 = scalar_lea.vmem [#allocation11], %s1347_s16  ;;  %p2967_p1 = scmp.ne.s32.totalorder %s2474_s25, 0 }
  0x87   : > { %v317_v0 = vld [vmem:[#allocation6] sm:$0xff] (!%p2967_p1) }
  0x88   : > { %316 = sbr.rel (%p2967_p1) target bundleno = 143 (0x8f), region = 60  ;;  %318 = vst [vmem:[#allocation12] sm:$0xff] (!%p2967_p1), %v317_v0 }
  0x8f PF: > { %v321_v1 = vld [vmem:[#allocation8] sm:$0xff]  ;;  %v322_v2 = vld [vmem:[#allocation8 + $0x8] sm:$0xff]  ;;  %v323_v3 = vld [vmem:[#allocation8 + $0x10] sm:$0xff]  ;;  %v2411_v4 = vmov 0.0|0.0   ;;  %vm2412_vm0 = vmmov 0   ;;  %v2413_v7 = vmov 0.0  }
  0x90   : > { %1854 = vmatprep.subr.bf16.mxu1 %v2411_v4  ;;  %v2672_v5 = vpack.c.bf16 %v322_v2, %v321_v1  ;;  %v324_v6 = vld [vmem:[#allocation8 + $0x18] sm:$0xff]  ;;  %1562 = vmatprep.mubr.msk.f32.mxu1 %vm2412_vm0, %v2413_v7  ;;  %v325_v9 = vld [vmem:[#allocation8 + $0x20] sm:$0xff]  ;;  %v326_v10 = vld [vmem:[#allocation8 + $0x28] sm:$0xff]  ;;  %s2414_s26 = smov [#allocation12]   ;;  %p2968_p9 = scmp.eq.s32.totalorder %s2474_s25, 1 }
  0x91   : > { %1902 = vmatprep.subr.bf16.mxu0 %v2411_v4  ;;  %1632 = vmatprep.mubr.msk.f32.mxu0 %vm2412_vm0, %v2413_v7  ;;  %v2680_v8 = vpack.c.bf16 %v324_v6, %v323_v3  ;;  %v2686_v11 = vpack.c.bf16 %v326_v10, %v325_v9  ;;  %v327_v12 = vld [vmem:[#allocation8 + $0x30] sm:$0xff]  ;;  %v328_v13 = vld [vmem:[#allocation8 + $0x38] sm:$0xff]  ;;  %v329_v15 = vld [vmem:[#allocation8 + $0x40] sm:$0xff]  ;;  %s1227_s19 = sshll.u32 %s2414_s26, 4  ;;  %s1228_s19 = int_to_ptr.vmem [resolvable:$true] %s1227_s19 }
  0x92   : > { %1856 = vmatpush3.bf16.msra.mxu1 %v2672_v5  ;;  %1904 = vmatpush3.bf16.msra.mxu0 %v2672_v5  ;;  %v2692_v14 = vpack.c.bf16 %v328_v13, %v327_v12  ;;  %v330_v16 = vld [vmem:[#allocation8 + $0x48] sm:$0xff]  ;;  %v331_v18 = vld [vmem:[#allocation8 + $0x50] sm:$0xff]  ;;  %v332_v19 = vld [vmem:[#allocation8 + $0x58] sm:$0xff]  ;;  %s2299_s9 = scalar_lea.vmem %s1228_s19, 128  ;;  %p2306_p11 = scmp.lt.s32.totalorder %s1228_s19, %s1228_s19 }
  0x93   : > { %1857 = vmatprep.subr.bf16.mxu1 %v2411_v4  ;;  %1905 = vmatprep.subr.bf16.mxu0 %v2411_v4  ;;  %v2698_v17 = vpack.c.bf16 %v330_v16, %v329_v15  ;;  %v2704_v20 = vpack.c.bf16 %v332_v19, %v331_v18  ;;  %v333_v21 = vld [vmem:[#allocation8 + $0x60] sm:$0xff]  ;;  %v334_v22 = vld [vmem:[#allocation8 + $0x68] sm:$0xff]  ;;  %v335_v24 = vld [vmem:[#allocation8 + $0x70] sm:$0xff]  ;;  %p2300_p4 = scmp.ne.s32.totalorder %s1228_s19, %s2299_s9  ;;  %p2307_p0 = scmp.lt.s32.totalorder %s2299_s9, %s2299_s9 }
  0x94   : > { %v2710_v23 = vpack.c.bf16 %v334_v22, %v333_v21  ;;  %v336_v25 = vld [vmem:[#allocation8 + $0x78] sm:$0xff]  ;;  %v319_v27 = vld [vmem:[#allocation12] sm:$0xff]  ;;  %v1354_v38 = vld [vmem:[%s2653_s14 + $0x10] sm:$0xff] }
  0x95   : > { %v2716_v26 = vpack.c.bf16 %v336_v25, %v335_v24  ;;  %v320_v28 = vld [vmem:[%s2653_s14] sm:$0xff]  ;;  %v1353_v33 = vld [vmem:[%s2653_s14 + $0x8] sm:$0xff]  ;;  %v1355_v43 = vld [vmem:[%s2653_s14 + $0x18] sm:$0xff]  ;;  %p2301_p3 = pnand %p2300_p4, %p2968_p9  ;;  %p2308_p13 = por %p2307_p0, %p2306_p11 }
  0x96   : > { %1859 = vmatpush3.bf16.msra.mxu1 %v2680_v8  ;;  %1907 = vmatpush3.bf16.msra.mxu0 %v2680_v8  ;;  %v1356_v48 = vld [vmem:[%s2653_s14 + $0x20] sm:$0xff]  ;;  %v1063_v53 = vld [vmem:[#allocation9] sm:$0xff]  ;;  %v1064_v54 = vld [vmem:[#allocation9 + $0x8] sm:$0xff] }
  0x97   : > { %1860 = vmatprep.subr.bf16.mxu1 %v2411_v4  ;;  %1908 = vmatprep.subr.bf16.mxu0 %v2411_v4  ;;  %v2046_v55 = vpack.c.bf16 %v1064_v54, %v1063_v53  ;;  %v1357_v56 = vld [vmem:[%s2653_s14 + $0x28] sm:$0xff]  ;;  %v1065_v60 = vld [vmem:[#allocation9 + $0x10] sm:$0xff]  ;;  %v1066_v61 = vld [vmem:[#allocation9 + $0x18] sm:$0xff]  ;;  %p2302_p7 = pneg %p2301_p3 }
  0x98   : > { %v2050_v62 = vpack.c.bf16 %v1066_v61, %v1065_v60  ;;  %v1067_v0 = vld [vmem:[#allocation9 + $0x20] sm:$0xff]  ;;  %v1068_v1 = vld [vmem:[#allocation9 + $0x28] sm:$0xff]  ;;  %v1069_v3 = vld [vmem:[#allocation9 + $0x30] sm:$0xff] }
  0x99   : > { %v2054_v2 = vpack.c.bf16 %v1068_v1, %v1067_v0  ;;  %v1071_v6 = vld [vmem:[#allocation9 + $0x40] sm:$0xff]  ;;  %v1073_v9 = vld [vmem:[#allocation9 + $0x50] sm:$0xff]  ;;  %v1074_v10 = vld [vmem:[#allocation9 + $0x58] sm:$0xff]  ;;  %p2309_p5 = pnand %p2308_p13, %p2302_p7 }
  0x9a   : > { %1862 = vmatpush3.bf16.msra.mxu1 %v2686_v11  ;;  %1910 = vmatpush3.bf16.msra.mxu0 %v2686_v11  ;;  %v1075_v12 = vld [vmem:[#allocation9 + $0x60] sm:$0xff]  ;;  %v1076_v13 = vld [vmem:[#allocation9 + $0x68] sm:$0xff]  ;;  %v1077_v15 = vld [vmem:[#allocation9 + $0x70] sm:$0xff] }
  0x9b   : > { %1863 = vmatprep.subr.bf16.mxu1 %v2411_v4  ;;  %1911 = vmatprep.subr.bf16.mxu0 %v2411_v4  ;;  %v1078_v16 = vld [vmem:[#allocation9 + $0x78] sm:$0xff]  ;;  %v1358_v18 = vld [vmem:[%s2653_s14 + $0x30] sm:$0xff] }
  0x9e   : > { %1865 = vmatpush3.bf16.msra.mxu1 %v2692_v14  ;;  %1913 = vmatpush3.bf16.msra.mxu0 %v2692_v14 }
  0x9f   : > { %1866 = vmatprep.subr.bf16.mxu1 %v2411_v4  ;;  %1914 = vmatprep.subr.bf16.mxu0 %v2411_v4 }
  0xa2   : > { %1868 = vmatpush3.bf16.msra.mxu1 %v2698_v17  ;;  %1916 = vmatpush3.bf16.msra.mxu0 %v2698_v17 }
  0xa3   : > { %1869 = vmatprep.subr.bf16.mxu1 %v2411_v4  ;;  %1917 = vmatprep.subr.bf16.mxu0 %v2411_v4 }
  0xa6   : > { %1871 = vmatpush3.bf16.msra.mxu1 %v2704_v20  ;;  %1919 = vmatpush3.bf16.msra.mxu0 %v2704_v20 }
  0xa7   : > { %1872 = vmatprep.subr.bf16.mxu1 %v2411_v4  ;;  %1920 = vmatprep.subr.bf16.mxu0 %v2411_v4 }
  0xaa   : > { %1874 = vmatpush3.bf16.msra.mxu1 %v2710_v23  ;;  %1922 = vmatpush3.bf16.msra.mxu0 %v2710_v23 }
  0xab   : > { %1875 = vmatprep.subr.bf16.mxu1 %v2411_v4  ;;  %1923 = vmatprep.subr.bf16.mxu0 %v2411_v4 }
  0xae   : > { %1877 = vmatpush3.bf16.msra.mxu1 %v2716_v26  ;;  %1925 = vmatpush3.bf16.msra.mxu0 %v2716_v26 }
  0xaf   : > { %1878 = vmatprep.subr.bf16.mxu1 %v2411_v4  ;;  %1950 = vmatprep.subr.bf16.mxu0 %v2411_v4 }
  0xb1   : > { %1563 = vmatmul.mubr.f32.vlgmr.msra.gmra.mrb[0].mxu1 %v319_v27 }
  0xb2   : > { %1880 = vmatpush3.bf16.msra.mxu1 %v2672_v5  ;;  %1597 = vmatprep.mubr.msk.f32.mxu1 %vm2412_vm0, %v2413_v7 }
  0xb3   : > { %1881 = vmatprep.subr.bf16.mxu1 %v2411_v4 }
  0xb6   : > { %1883 = vmatpush3.bf16.msra.mxu1 %v2680_v8 }
  0xb7   : > { %1884 = vmatprep.subr.bf16.mxu1 %v2411_v4 }
  0xba   : > { %1886 = vmatpush3.bf16.msra.mxu1 %v2686_v11 }
  0xbb   : > { %1887 = vmatprep.subr.bf16.mxu1 %v2411_v4 }
  0xbe   : > { %1889 = vmatpush3.bf16.msra.mxu1 %v2692_v14 }
  0xbf   : > { %1890 = vmatprep.subr.bf16.mxu1 %v2411_v4 }
  0xc2   : > { %1892 = vmatpush3.bf16.msra.mxu1 %v2698_v17 }
  0xc3   : > { %1893 = vmatprep.subr.bf16.mxu1 %v2411_v4 }
  0xc6   : > { %1895 = vmatpush3.bf16.msra.mxu1 %v2704_v20 }
  0xc7   : > { %1896 = vmatprep.subr.bf16.mxu1 %v2411_v4 }
  0xca   : > { %1898 = vmatpush3.bf16.msra.mxu1 %v2710_v23 }
  0xcb   : > { %1899 = vmatprep.subr.bf16.mxu1 %v2411_v4 }
  0xce   : > { %1901 = vmatpush3.bf16.msra.mxu1 %v2716_v26 }
  0xcf   : > { %1926 = vmatprep.subr.bf16.mxu1 %v2411_v4 }
 0x184   : > { %v403_v29 = vpop.f32.mrb[0].mxu1 }
 0x185   : > { %v407_v30 = vadd.f32 %v403_v29, %v320_v28  ;;  %v1564_v31 = vpop.f32.mrb[1].mxu1 }
 0x187   : > { %2169 = vtanh.f32 %v407_v30 }
 0x191   : > { %v2744_v32 = vpop.eup %2169 }
 0x192   : > { %1598 = vmatmul.mubr.f32.vlgmr.msra.gmra.mrb[2].mxu1 %v2744_v32 }
 0x193   : > { %1928 = vmatpush3.bf16.msra.mxu1 %v2672_v5  ;;  %1667 = vmatprep.mubr.msk.f32.mxu1 %vm2412_vm0, %v2413_v7 }
 0x194   : > { %1929 = vmatprep.subr.bf16.mxu1 %v2411_v4 }
 0x197   : > { %1931 = vmatpush3.bf16.msra.mxu1 %v2680_v8 }
 0x198   : > { %1932 = vmatprep.subr.bf16.mxu1 %v2411_v4 }
 0x19b   : > { %1934 = vmatpush3.bf16.msra.mxu1 %v2686_v11 }
 0x19c   : > { %1935 = vmatprep.subr.bf16.mxu1 %v2411_v4 }
 0x19f   : > { %1937 = vmatpush3.bf16.msra.mxu1 %v2692_v14 }
 0x1a0   : > { %1938 = vmatprep.subr.bf16.mxu1 %v2411_v4 }
 0x1a3   : > { %1940 = vmatpush3.bf16.msra.mxu1 %v2698_v17 }
 0x1a4   : > { %1941 = vmatprep.subr.bf16.mxu1 %v2411_v4 }
 0x1a7   : > { %1943 = vmatpush3.bf16.msra.mxu1 %v2704_v20 }
 0x1a8   : > { %1944 = vmatprep.subr.bf16.mxu1 %v2411_v4 }
 0x1ab   : > { %1946 = vmatpush3.bf16.msra.mxu1 %v2710_v23 }
 0x1ac   : > { %1947 = vmatprep.subr.bf16.mxu1 %v2411_v4 }
 0x1af   : > { %1949 = vmatpush3.bf16.msra.mxu1 %v2716_v26 }
 0x1b0   : > { %1974 = vmatprep.subr.bf16.mxu1 %v2411_v4 }
 0x265   : > { %v494_v34 = vpop.f32.mrb[2].mxu1 }
 0x266   : > { %v498_v35 = vadd.f32 %v1353_v33, %v494_v34  ;;  %v1599_v36 = vpop.f32.mrb[3].mxu1 }
 0x267   : > { %v1359_v36 = vld [vmem:[%s2653_s14 + $0x38] sm:$0xff] }
 0x268   : > { %2171 = vtanh.f32 %v498_v35 }
 0x272   : > { %v2766_v37 = vpop.eup %2171 }
 0x273   : > { %1633 = vmatmul.mubr.f32.vlgmr.msra.gmra.mrb[0].mxu0 %v2766_v37 }
 0x274   : > { %1952 = vmatpush3.bf16.msra.mxu0 %v2672_v5  ;;  %1702 = vmatprep.mubr.msk.f32.mxu0 %vm2412_vm0, %v2413_v7 }
 0x275   : > { %1953 = vmatprep.subr.bf16.mxu0 %v2411_v4 }
 0x278   : > { %1955 = vmatpush3.bf16.msra.mxu0 %v2680_v8 }
 0x279   : > { %1956 = vmatprep.subr.bf16.mxu0 %v2411_v4 }
 0x27c   : > { %1958 = vmatpush3.bf16.msra.mxu0 %v2686_v11 }
 0x27d   : > { %1959 = vmatprep.subr.bf16.mxu0 %v2411_v4 }
 0x280   : > { %1961 = vmatpush3.bf16.msra.mxu0 %v2692_v14 }
 0x281   : > { %1962 = vmatprep.subr.bf16.mxu0 %v2411_v4 }
 0x284   : > { %1964 = vmatpush3.bf16.msra.mxu0 %v2698_v17 }
 0x285   : > { %1965 = vmatprep.subr.bf16.mxu0 %v2411_v4 }
 0x288   : > { %1967 = vmatpush3.bf16.msra.mxu0 %v2704_v20 }
 0x289   : > { %1968 = vmatprep.subr.bf16.mxu0 %v2411_v4 }
 0x28c   : > { %1970 = vmatpush3.bf16.msra.mxu0 %v2710_v23 }
 0x28d   : > { %1971 = vmatprep.subr.bf16.mxu0 %v2411_v4 }
 0x290   : > { %1973 = vmatpush3.bf16.msra.mxu0 %v2716_v26 }
 0x291   : > { %1998 = vmatprep.subr.bf16.mxu0 %v2411_v4 }
 0x346   : > { %v586_v39 = vpop.f32.mrb[0].mxu0 }
 0x347   : > { %v590_v40 = vadd.f32 %v1354_v38, %v586_v39  ;;  %v1634_v41 = vpop.f32.mrb[1].mxu0 }
 0x349   : > { %2173 = vtanh.f32 %v590_v40 }
 0x353   : > { %v2788_v42 = vpop.eup %2173 }
 0x354   : > { %1668 = vmatmul.mubr.f32.vlgmr.msra.gmra.mrb[4].mxu1 %v2788_v42 }
 0x355   : > { %1976 = vmatpush3.bf16.msra.mxu1 %v2672_v5  ;;  %1737 = vmatprep.mubr.msk.f32.mxu1 %vm2412_vm0, %v2413_v7 }
 0x356   : > { %1977 = vmatprep.subr.bf16.mxu1 %v2411_v4 }
 0x359   : > { %1979 = vmatpush3.bf16.msra.mxu1 %v2680_v8 }
 0x35a   : > { %1980 = vmatprep.subr.bf16.mxu1 %v2411_v4 }
 0x35d   : > { %1982 = vmatpush3.bf16.msra.mxu1 %v2686_v11 }
 0x35e   : > { %1983 = vmatprep.subr.bf16.mxu1 %v2411_v4 }
 0x361   : > { %1985 = vmatpush3.bf16.msra.mxu1 %v2692_v14 }
 0x362   : > { %1986 = vmatprep.subr.bf16.mxu1 %v2411_v4 }
 0x365   : > { %1988 = vmatpush3.bf16.msra.mxu1 %v2698_v17 }
 0x366   : > { %1989 = vmatprep.subr.bf16.mxu1 %v2411_v4 }
 0x369   : > { %1991 = vmatpush3.bf16.msra.mxu1 %v2704_v20 }
 0x36a   : > { %1992 = vmatprep.subr.bf16.mxu1 %v2411_v4 }
 0x36d   : > { %1994 = vmatpush3.bf16.msra.mxu1 %v2710_v23 }
 0x36e   : > { %1995 = vmatprep.subr.bf16.mxu1 %v2411_v4 }
 0x371   : > { %1997 = vmatpush3.bf16.msra.mxu1 %v2716_v26 }
 0x372   : > { %2022 = vmatprep.subr.bf16.mxu1 %v2411_v4 }
 0x427   : > { %v678_v44 = vpop.f32.mrb[4].mxu1 }
 0x428   : > { %v682_v45 = vadd.f32 %v1355_v43, %v678_v44  ;;  %v1669_v46 = vpop.f32.mrb[5].mxu1 }
 0x42a   : > { %2175 = vtanh.f32 %v682_v45 }
 0x434   : > { %v2810_v47 = vpop.eup %2175 }
 0x435   : > { %1703 = vmatmul.mubr.f32.vlgmr.msra.gmra.mrb[2].mxu0 %v2810_v47 }
 0x436   : > { %2000 = vmatpush3.bf16.msra.mxu0 %v2672_v5  ;;  %1772 = vmatprep.mubr.msk.f32.mxu0 %vm2412_vm0, %v2413_v7 }
 0x437   : > { %2001 = vmatprep.subr.bf16.mxu0 %v2411_v4 }
 0x43a   : > { %2003 = vmatpush3.bf16.msra.mxu0 %v2680_v8 }
 0x43b   : > { %2004 = vmatprep.subr.bf16.mxu0 %v2411_v4 }
 0x43e   : > { %2006 = vmatpush3.bf16.msra.mxu0 %v2686_v11 }
 0x43f   : > { %2007 = vmatprep.subr.bf16.mxu0 %v2411_v4 }
 0x442   : > { %2009 = vmatpush3.bf16.msra.mxu0 %v2692_v14 }
 0x443   : > { %2010 = vmatprep.subr.bf16.mxu0 %v2411_v4 }
 0x446   : > { %2012 = vmatpush3.bf16.msra.mxu0 %v2698_v17 }
 0x447   : > { %2013 = vmatprep.subr.bf16.mxu0 %v2411_v4 }
 0x44a   : > { %2015 = vmatpush3.bf16.msra.mxu0 %v2704_v20 }
 0x44b   : > { %2016 = vmatprep.subr.bf16.mxu0 %v2411_v4 }
 0x44e   : > { %2018 = vmatpush3.bf16.msra.mxu0 %v2710_v23 }
 0x44f   : > { %2019 = vmatprep.subr.bf16.mxu0 %v2411_v4 }
 0x452   : > { %2021 = vmatpush3.bf16.msra.mxu0 %v2716_v26 }
 0x453   : > { %2047 = vmatprep.subr.bf16.mxu0 %v2046_v55 }
 0x508   : > { %v770_v49 = vpop.f32.mrb[2].mxu0 }
 0x509   : > { %v774_v50 = vadd.f32 %v1356_v48, %v770_v49  ;;  %v1704_v51 = vpop.f32.mrb[3].mxu0 }
 0x50b   : > { %2177 = vtanh.f32 %v774_v50 }
 0x515   : > { %v2831_v52 = vpop.eup %2177 }
 0x516   : > { %1738 = vmatmul.mubr.f32.vlgmr.msra.gmra.mrb[6].mxu1 %v2831_v52 }
 0x517   : > { %2024 = vmatpush3.bf16.msra.mxu1 %v2672_v5  ;;  %1807 = vmatprep.mubr.msk.f32.mxu1 %vm2412_vm0, %v2413_v7  ;;  %v1072_v7 = vld [vmem:[#allocation9 + $0x48] sm:$0xff] }
 0x518   : > { %2025 = vmatprep.subr.bf16.mxu1 %v2411_v4 }
 0x51b   : > { %2027 = vmatpush3.bf16.msra.mxu1 %v2680_v8  ;;  %v2062_v8 = vpack.c.bf16 %v1072_v7, %v1071_v6 }
 0x51c   : > { %2028 = vmatprep.subr.bf16.mxu1 %v2411_v4 }
 0x51f   : > { %2030 = vmatpush3.bf16.msra.mxu1 %v2686_v11  ;;  %v2066_v11 = vpack.c.bf16 %v1074_v10, %v1073_v9 }
 0x520   : > { %2031 = vmatprep.subr.bf16.mxu1 %v2411_v4 }
 0x523   : > { %2033 = vmatpush3.bf16.msra.mxu1 %v2692_v14  ;;  %v2070_v14 = vpack.c.bf16 %v1076_v13, %v1075_v12 }
 0x524   : > { %2034 = vmatprep.subr.bf16.mxu1 %v2411_v4 }
 0x527   : > { %2036 = vmatpush3.bf16.msra.mxu1 %v2698_v17  ;;  %v2074_v17 = vpack.c.bf16 %v1078_v16, %v1077_v15 }
 0x528   : > { %2037 = vmatprep.subr.bf16.mxu1 %v2411_v4 }
 0x52b   : > { %2039 = vmatpush3.bf16.msra.mxu1 %v2704_v20 }
 0x52c   : > { %2040 = vmatprep.subr.bf16.mxu1 %v2411_v4 }
 0x52f   : > { %2042 = vmatpush3.bf16.msra.mxu1 %v2710_v23  ;;  %v1360_v23 = vld [vmem:[%s2947_s4] ss:$0 sm:$0xff] }
 0x530   : > { %2043 = vmatprep.subr.bf16.mxu1 %v2411_v4  ;;  %v1070_v4 = vld [vmem:[#allocation9 + $0x38] sm:$0xff] }
 0x531   : > { %v2058_v5 = vpack.c.bf16 %v1070_v4, %v1069_v3 }
 0x533   : > { %2045 = vmatpush3.bf16.msra.mxu1 %v2716_v26 }
 0x5e9   : > { %v862_v57 = vpop.f32.mrb[6].mxu1 }
 0x5ea   : > { %v866_v58 = vadd.f32 %v1357_v56, %v862_v57  ;;  %v1739_v59 = vpop.f32.mrb[7].mxu1 }
 0x5ec   : > { %2179 = vtanh.f32 %v866_v58 }
 0x5f6   : > { %v2180_v63 = vpop.eup %2179 }
 0x5f7   : > { %1773 = vmatmul.mubr.f32.vlgmr.msra.gmra.mrb[4].mxu0 %v2180_v63 }
 0x5f8   : > { %2049 = vmatpush3.bf16.msra.mxu0 %v2046_v55  ;;  %1842 = vmatprep.mubr.f32.mxu0 %v2744_v32 }
 0x5f9   : > { %2051 = vmatprep.subr.bf16.mxu0 %v2050_v62 }
 0x5fc   : > { %2053 = vmatpush3.bf16.msra.mxu0 %v2050_v62 }
 0x5fd   : > { %2055 = vmatprep.subr.bf16.mxu0 %v2054_v2 }
 0x600   : > { %2057 = vmatpush3.bf16.msra.mxu0 %v2054_v2 }
 0x601   : > { %2059 = vmatprep.subr.bf16.mxu0 %v2058_v5 }
 0x604   : > { %2061 = vmatpush3.bf16.msra.mxu0 %v2058_v5 }
 0x605   : > { %2063 = vmatprep.subr.bf16.mxu0 %v2062_v8 }
 0x608   : > { %2065 = vmatpush3.bf16.msra.mxu0 %v2062_v8 }
 0x609   : > { %2067 = vmatprep.subr.bf16.mxu0 %v2066_v11 }
 0x60c   : > { %2069 = vmatpush3.bf16.msra.mxu0 %v2066_v11 }
 0x60d   : > { %2071 = vmatprep.subr.bf16.mxu0 %v2070_v14 }
 0x610   : > { %2073 = vmatpush3.bf16.msra.mxu0 %v2070_v14 }
 0x611   : > { %2075 = vmatprep.subr.bf16.mxu0 %v2074_v17 }
 0x614   : > { %2077 = vmatpush3.bf16.msra.mxu0 %v2074_v17 }
 0x617   : > { %1843 = vmatmul.mubr.f32.vlgmr.msra.gmra.mrb[6].mxu0 %v2766_v37 }
 0x618   : > { %1845 = vmatprep.mubr.f32.mxu0 %v2788_v42 }
 0x61b   : > { %1846 = vmatmul.mubr.f32.gmra.mrb[8].mxu0 %v2810_v47 }
 0x61c   : > { %1848 = vmatprep.mubr.f32.mxu0 %v2831_v52 }
 0x61f   : > { %1849 = vmatmul.mubr.f32.gmra.mrb[10].mxu0 %v2180_v63 }
 0x6ca   : > { %v954_v19 = vpop.f32.mrb[4].mxu0 }
 0x6cb   : > { %v958_v20 = vadd.f32 %v1358_v18, %v954_v19  ;;  %v1774_v21 = vpop.f32.mrb[5].mxu0 }
 0x6cd   : > { %2181 = vtanh.f32 %v958_v20 }
 0x6d7   : > { %v2182_v22 = vpop.eup %2181 }
 0x6d8   : > { %1808 = vmatmul.mubr.f32.vlgmr.msra.gmra.mrb[8].mxu1 %v2182_v22  ;;  %1851 = vmatprep.mubr.f32.mxu0 %v2182_v22 }
 0x6ea   : > { %v1844_v24 = vpop.f32.mrb[6].mxu0 }
 0x6eb   : > { %v1158_v25 = vadd.f32 %v1844_v24, %v1360_v23  ;;  %v1152_v26 = vpop.f32.mrb[7].mxu0 }
 0x6ec   : > { %v1153_v27 = vadd.f32 %v1360_v23, %v1152_v26 }
 0x6ed   : > { %1192 = vst [vmem:[%s2667_s29 + $0x8] sm:$0xff] %v1158_v25 }
 0x6ee   : > { %1191 = vst [vmem:[%s2667_s29] sm:$0xff] %v1153_v27  ;;  %v1847_v28 = vpop.f32.mrb[8].mxu0 }
 0x6ef   : > { %v1168_v29 = vadd.f32 %v1847_v28, %v1360_v23  ;;  %v1162_v30 = vpop.f32.mrb[9].mxu0 }
 0x6f0   : > { %v1163_v31 = vadd.f32 %v1360_v23, %v1162_v30 }
 0x6f1   : > { %1194 = vst [vmem:[%s2667_s29 + $0x18] sm:$0xff] %v1168_v29 }
 0x6f2   : > { %1193 = vst [vmem:[%s2667_s29 + $0x10] sm:$0xff] %v1163_v31  ;;  %v1850_v32 = vpop.f32.mrb[10].mxu0 }
 0x6f3   : > { %v1178_v33 = vadd.f32 %v1850_v32, %v1360_v23  ;;  %v1172_v34 = vpop.f32.mrb[11].mxu0 }
 0x6f4   : > { %v1173_v35 = vadd.f32 %v1360_v23, %v1172_v34 }
 0x6f5   : > { %1196 = vst [vmem:[%s2667_s29 + $0x28] sm:$0xff] %v1178_v33 }
 0x6f6   : > { %1195 = vst [vmem:[%s2667_s29 + $0x20] sm:$0xff] %v1173_v35 }
 0x7ab   : > { %v1046_v37 = vpop.f32.mrb[8].mxu1 }
 0x7ac   : > { %v1050_v38 = vadd.f32 %v1359_v36, %v1046_v37  ;;  %v1809_v39 = vpop.f32.mrb[9].mxu1 }
 0x7ae   : > { %2183 = vtanh.f32 %v1050_v38 }
 0x7b8   : > { %v2184_v40 = vpop.eup %2183 }
 0x7b9   : > { %1054 = vst [vmem:[#allocation12] sm:$0xff] %v2184_v40  ;;  %1852 = vmatmul.mubr.f32.gmra.mrb[12].mxu0 %v2184_v40 }
 0x7ba   : > { %2312 = shalt.err (!%p2309_p5)
}
 0x7bb   : > { %s2313_s15 = scalar_lea.hbm %s2949_s6, 128  ;;  %p2969_p8 = pmov %p2968_p9 }
 0x7bc   : > { %p2314_p12 = scmp.ne.s32.totalorder %s2949_s6, %s2313_s15  ;;  %p2319_p1 = scmp.lt.u32.totalorder %s2313_s15, %s2949_s6 }
 0x7be   : > { %p2315_p10 = pnand %p2314_p12, %p2969_p8 }
 0x7c0   : > { %p2316_p2 = pneg %p2315_p10 }
 0x7c2   : > { %p2321_p4 = pnand %p2319_p1, %p2316_p2 }
 0x7c4   : > { %2324 = shalt.err (!%p2321_p4)
}
 0x7c5   : > { %p2970_p9 = pmov %p2969_p8  ;;  %s1369_s20 = sshll.u32 %s2474_s25, 10 }
 0x7c6   : > { %s1213_s26 = sshll.u32 %s2667_s29, 4  ;;  %s2891_s10 = scalar_lea.hbm %s2948_s5, %s1369_s20  ;;  %s2893_s26 = int_to_ptr.vmem [resolvable:$true] %s1213_s26 }
 0x7c7   : > { %2094 = dma.vmem_to_hbm [thread:$0]  (%p2970_p9), %s1228_s19, 128, %s2949_s6, [#allocation13]  }
 0x7c8   : > { %s1200_s15 = scalar_lea.sflag [#allocation5], %s2649_s8  ;;  %s2325_s19 = scalar_lea.vmem %s2893_s26, 1024 }
 0x7c9   : > { %p2326_p3 = scmp.ne.s32.totalorder %s2893_s26, %s2325_s19  ;;  %s2415_s12 = smov [#allocation11]  }
 0x7ca   : > { %s2329_s17 = sshll.u32 %s2415_s12, 4  ;;  %s2330_s17 = int_to_ptr.vmem [resolvable:$false] %s2329_s17 }
 0x7cb   : > { %p2327_p7 = pnand %p2326_p3, %p2598_p6  ;;  %s2331_s16 = scalar_lea.vmem %s2330_s17, 2048 }
 0x7cc   : > { %p2332_p0 = scmp.lt.s32.totalorder %s2893_s26, %s2330_s17  ;;  %p2333_p13 = scmp.lt.s32.totalorder %s2331_s16, %s2325_s19 }
 0x7cd   : > { %p2328_p11 = pneg %p2327_p7 }
 0x7ce   : > { %p2334_p5 = por %p2333_p13, %p2332_p0 }
 0x7d0   : > { %p2335_p12 = pnand %p2334_p5, %p2328_p11 }
 0x88c   : > { %v1853_v41 = vpop.f32.mrb[12].mxu0 }
 0x88d   : > { %v1188_v42 = vadd.f32 %v1853_v41, %v1360_v23  ;;  %v1182_v43 = vpop.f32.mrb[13].mxu0 }
 0x88e   : > { %v1183_v44 = vadd.f32 %v1360_v23, %v1182_v43 }
 0x88f   : > { %1198 = vst [vmem:[%s2667_s29 + $0x38] sm:$0xff] %v1188_v42 }
 0x890   : > { %1197 = vst [vmem:[%s2667_s29 + $0x30] sm:$0xff] %v1183_v44 }
 0x891   : > { %2338 = shalt.err (!%p2335_p12)
}
 0x892   : > { %s2339_s29 = scalar_lea.hbm %s2891_s10, 1024  ;;  %s2343_s27 = scalar_lea.hbm %s2948_s5, 2048 }
 0x893   : > { %p2340_p8 = scmp.ne.s32.totalorder %s2891_s10, %s2339_s29  ;;  %p2344_p1 = scmp.lt.u32.totalorder %s2891_s10, %s2948_s5 }
 0x894   : > { %p2345_p4 = scmp.lt.u32.totalorder %s2343_s27, %s2339_s29  ;;  %p2347_p3 = scmp.lt.u32.totalorder %s2339_s29, %s2891_s10 }
 0x895   : > { %p2341_p10 = pnand %p2340_p8, %p2598_p6 }
 0x896   : > { %p2346_p9 = por %p2345_p4, %p2344_p1 }
 0x897   : > { %p2342_p2 = pneg %p2341_p10 }
 0x898   : > { %p2348_p7 = por %p2347_p3, %p2346_p9 }
 0x89a   : > { %p2349_p11 = pnand %p2348_p7, %p2342_p2 }
 0x89c   : > { %2352 = shalt.err (!%p2349_p11)
}
 0x89d   : > { %s2416_s30 = smov 128   ;;  %s2417_s19 = smov 8  }
 0x89e   : > { %2092 = dma.vmem_to_hbm [thread:$0]  (%p2598_p6), %s2893_s26, 1024, %s2891_s10, %s1200_s15, %s2416_s30, %s2416_s30, %s2417_s19  }
 0x89f   : > { %p2971_p0 = scmp.eq.s32.totalorder %s2474_s25, 1 }
 0x8a1   : > { %2382 = dma.done.wait (%p2971_p0), [#allocation13], 128   ;;  %p2972_p13 = pmov %p2971_p0 }
 0x8a3   : > { %2384 = vsyncadd (%p2972_p13), [#allocation13], 4294967168 }
 0x8a4 PF: > { %s1243_s12 = sand.u32 1, %s2391_s21   ;;  %p2973_p5 = scmp.ne.s32.totalorder %s2954_s28, 0 }
 0x8a5   : > { %p2974_p12 = scmp.ge.s32.totalorder %s2403_s24, 2  ;;  %s1244_s17 = scalar_lea.sflag [#allocation5], %s1243_s12 }
 0x8a7   : > { %p2113_p8 = pnand %p2974_p12, %p2973_p5 }
 0x8a9   : > { %2386 = dma.done.wait (!%p2113_p8), %s1244_s17, 1024  }
 0x8aa   : > { %2388 = vsyncadd (!%p2113_p8), %s1244_s17, 4294966272  ;;  %p23_p6 = scmp.ge.s32.totalorder %s2584_s18, 4   ;;  %s2975_s21 = smov %s2395_s22 }
 0x8ab   : > { %s2976_s22 = smov %s2399_s23  ;;  %s2977_s23 = smov %s2594_s11 }
 0x8ac   : > { %s2978_s24 = smov %s2584_s18  ;;  %25 = sbr.rel (!%p23_p6) target bundleno = 8 (0x8), region = 123 }
 0x8b3   :  { %1249 = vsyncpa [#allocation4], 1 }
 0x8b4   :  { %1251 = vsyncpa [#allocation4 + $0x1], 1 }
 0x8b5   :  { %1252 = vsyncpa [#allocation7], 1 }
 0x8b6   :  { %1253 = vsyncpa [#allocation10], 1 }
 0x8b7   :  { %1254 = vsyncpa [#allocation5], 1 }
 0x8b8   :  { %1256 = vsyncpa [#allocation5 + $0x1], 1 }
 0x8b9   :  { %1257 = vsyncpa [#allocation13], 1 }

</bundles_post_ra>
